<compile_context>
chip_gen: v6e
topology: v6e:2x2x1
jax: 0.10.0
libtpu: 0.0.40
codegen_flags: <defaults>
</compile_context>

<pallas_src>
import jax
import jax.numpy as jnp
from jax.experimental import pallas as pl
from jax.experimental.pallas import tpu as pltpu


def _round_up(v, m):
    return ((v + m - 1) // m) * m


def _physical_vmem_bytes():
    """Per-core VMEM capacity; conservative v7x value if the query fails."""
    try:
        cap = getattr(pltpu.get_tpu_info(), "vmem_capacity_bytes", None)
        return int(cap) if cap else 64 << 20
    except Exception:
        return 64 << 20


def _choose_tile_n(N, tile_n):
    """Row tile: sublane/256 aligned; >= 2 grid steps whenever possible."""
    tile_n = max(8, int(tile_n))
    # Keep at least 2 grid steps so ("parallel",) can shard across v7x's 2 TCs.
    tile_n = min(tile_n, max(8, _round_up(pl.cdiv(N, 2), 8)))
    if tile_n >= 256:
        tile_n = (tile_n // 256) * 256   # MXU-pass-friendly row alignment
    else:
        tile_n = _round_up(tile_n, 8)    # sublane alignment
    return tile_n


def _make_kernel(d_pad, c_is_one, compute_dtype):
    def kernel(x_ref, wab_ref, bab_ref, wc_ref, bc_ref, o_ref):
        # x tile: (tile_n, L).  Cast to the MXU compute dtype (bf16 default);
        # accumulate in f32.
        x = x_ref[...].astype(compute_dtype)
        y = jnp.dot(x, wab_ref[...], preferred_element_type=jnp.float32)
        y = y + bab_ref[...]                              # (tile_n, 2*Dp) f32

        # attention_a: tanh ; attention_b: sigmoid via tanh (one EUP op).
        # Column split is lane-aligned because d_pad % 128 == 0.
        a = jnp.tanh(y[:, :d_pad])
        b = 0.5 * (jnp.tanh(0.5 * y[:, d_pad:]) + 1.0)
        gated = a * b                                     # (tile_n, Dp) f32

        if c_is_one:
            # attention_c with n_classes == 1: VALU mul + XLU lane reduce.
            out = jnp.sum(gated * wc_ref[...], axis=-1, keepdims=True) + bc_ref[...]
        else:
            out = jnp.dot(gated, wc_ref[...],
                          preferred_element_type=jnp.float32) + bc_ref[...]
        o_ref[...] = out.astype(o_ref.dtype)

    return kernel


def attn_net_gated_score(x, wa, ba, wb, bb, wc, bc, *, tile_n=1024,
                         compute_dtype=jnp.bfloat16):
    """Forward pass of Attn_Net_Gated_Score (eval mode).

    x  : (N, L)   -- for best HBM bandwidth, store x in bf16 upstream; this
                     wrapper never adds a standalone astype pass over x.
    wa : (L, D)   ba : (1, D)      -- attention_a Linear (pre-transposed)
    wb : (L, D)   bb : (1, D)      -- attention_b Linear (pre-transposed)
    wc : (D, C)   bc : (1, C)      -- attention_c Linear (pre-transposed)
    returns (N, C)

    compute_dtype: dtype fed to the MXU for the fused (L, 2D) matmul
      (bf16 default; pass jnp.float32 for exact f32 math).  Accumulation and
      all elementwise math are f32 regardless.
    """
    N, L = x.shape
    D = wa.shape[1]
    C = wc.shape[1]

    # --- pad D to a lane-tile multiple so the in-kernel column split aligns --
    d_pad = _round_up(D, 128)
    pd = d_pad - D
    wa_p = jnp.pad(wa, ((0, 0), (0, pd))) if pd else wa
    wb_p = jnp.pad(wb, ((0, 0), (0, pd))) if pd else wb
    ba_p = jnp.pad(ba, ((0, 0), (0, pd))) if pd else ba
    bb_p = jnp.pad(bb, ((0, 0), (0, pd))) if pd else bb

    # --- fuse the two branch Linears into one (L, 2*Dp) matmul ---------------
    wab = jnp.concatenate([wa_p, wb_p], axis=1).astype(compute_dtype)  # (L, 2Dp)
    bab = jnp.concatenate([ba_p, bb_p], axis=1).astype(jnp.float32)    # (1, 2Dp)

    c_is_one = (C == 1)
    if c_is_one:
        wc_arg = wc.reshape(1, D)                                      # (1, D) row
        if pd:
            wc_arg = jnp.pad(wc_arg, ((0, 0), (0, pd)))
        wc_arg = wc_arg.astype(jnp.float32)                            # (1, Dp)
    else:
        wc_arg = jnp.pad(wc, ((0, pd), (0, 0))) if pd else wc
        wc_arg = wc_arg.astype(jnp.float32)                            # (Dp, C)
    bc_arg = bc.astype(jnp.float32)                                    # (1, C)

    # --- row tiling: stream x, bound VMEM, keep >=2 grid steps ---------------
    tile_n = _choose_tile_n(N, tile_n)
    grid = (pl.cdiv(N, tile_n),)

    # --- VMEM budget: tile-derived, clamped to physical capacity -------------
    x_bytes = jnp.dtype(x.dtype).itemsize
    w_bytes = jnp.dtype(compute_dtype).itemsize
    est = (2 * tile_n * L * x_bytes              # x tile, double-buffered
           + 2 * L * (2 * d_pad) * w_bytes       # fused weights (worst case x2)
           + 2 * tile_n * C * 4                  # output tile, double-buffered
           + 4 * tile_n * (2 * d_pad) * 4        # f32 intermediates y/a/b/gated
           + 4 * (3 * d_pad + 2 * C) * 4)        # biases / wc row (small)
    vmem_limit = min(max(2 * est + (4 << 20), 32 << 20), _physical_vmem_bytes())

    kernel = _make_kernel(d_pad, c_is_one, compute_dtype)

    in_specs = [
        pl.BlockSpec((tile_n, L), lambda i: (i, 0)),      # x rows (streamed)
        pl.BlockSpec(wab.shape, lambda i: (0, 0)),        # fused wa|wb (resident)
        pl.BlockSpec(bab.shape, lambda i: (0, 0)),        # fused ba|bb
        pl.BlockSpec(wc_arg.shape, lambda i: (0, 0)),     # wc
        pl.BlockSpec(bc_arg.shape, lambda i: (0, 0)),     # bc
    ]

    return pl.pallas_call(
        kernel,
        out_shape=jax.ShapeDtypeStruct((N, C), x.dtype),
        grid_spec=pltpu.PrefetchScalarGridSpec(
            num_scalar_prefetch=0,
            grid=grid,
            in_specs=in_specs,
            out_specs=pl.BlockSpec((tile_n, C), lambda i: (i, 0)),
        ),
        compiler_params=pltpu.CompilerParams(
            dimension_semantics=("parallel",),
            vmem_limit_bytes=int(vmem_limit),
        ),
    )(x, wab, bab, wc_arg, bc_arg)


def reference(x, wa, ba, wb, bb, wc, bc):
    a = jnp.tanh(x @ wa + ba)
    b = jax.nn.sigmoid(x @ wb + bb)
    return (a * b) @ wc + bc


if __name__ == "__main__":
    # Small shapes consistent with the module: L (in features), D (hidden), C classes.
    N, L, D = 64, 32, 16
    key = jax.random.PRNGKey(0)
    keys = jax.random.split(key, 9)

    x = jax.random.normal(keys[0], (N, L), dtype=jnp.float32)

    # PyTorch Linear weight is (out, in); stored here pre-transposed as (in, out).
    wa = jax.random.normal(keys[1], (L, D), dtype=jnp.float32) * 0.1
    ba = jax.random.normal(keys[2], (1, D), dtype=jnp.float32) * 0.1
    wb = jax.random.normal(keys[3], (L, D), dtype=jnp.float32) * 0.1
    bb = jax.random.normal(keys[4], (1, D), dtype=jnp.float32) * 0.1
    wc1 = jax.random.normal(keys[5], (D, 1), dtype=jnp.float32) * 0.1
    bc1 = jax.random.normal(keys[6], (1, 1), dtype=jnp.float32) * 0.1
    wc3 = jax.random.normal(keys[7], (D, 3), dtype=jnp.float32) * 0.1
    bc3 = jax.random.normal(keys[8], (1, 3), dtype=jnp.float32) * 0.1

    ref1 = reference(x, wa, ba, wb, bb, wc1, bc1)

    # f32 MXU path, n_classes == 1 (tile divides N, grid of 2 steps).
    out = jax.block_until_ready(attn_net_gated_score(
        x, wa, ba, wb, bb, wc1, bc1, compute_dtype=jnp.float32))
    assert out.shape == (N, 1)
    assert jnp.allclose(out, ref1, atol=1e-5, rtol=1e-5), "f32 mismatch vs reference"

    # Ragged edge block: N not a multiple of the tile, no host-side padding of x.
    N2 = 50
    out2 = jax.block_until_ready(attn_net_gated_score(
        x[:N2], wa, ba, wb, bb, wc1, bc1, compute_dtype=jnp.float32))
    assert out2.shape == (N2, 1)
    assert jnp.allclose(out2, ref1[:N2], atol=1e-5, rtol=1e-5), "ragged-edge mismatch"

    # n_classes > 1: MXU projection branch.
    ref3 = reference(x, wa, ba, wb, bb, wc3, bc3)
    out3 = jax.block_until_ready(attn_net_gated_score(
        x, wa, ba, wb, bb, wc3, bc3, compute_dtype=jnp.float32))
    assert out3.shape == (N, 3)
    assert jnp.allclose(out3, ref3, atol=1e-5, rtol=1e-5), "n_classes>1 mismatch"

    # Default bf16 MXU path (f32 accumulation + f32 elementwise), looser tolerance.
    outb = jax.block_until_ready(attn_net_gated_score(x, wa, ba, wb, bb, wc1, bc1))
    assert jnp.allclose(outb, ref1, atol=3e-2, rtol=3e-2), "bf16 mismatch"

    print("KERNEL_OK")
</pallas_src>

<mosaic_0001>
module attributes {stable_mosaic.version = 11 : i64} {
  func.func @kernel(%arg0: i32, %arg1: memref<32x32xf32, #tpu.memory_space<vmem>>, %arg2: memref<32x256xf32, #tpu.memory_space<vmem>>, %arg3: memref<1x256xf32, #tpu.memory_space<vmem>>, %arg4: memref<1x128xf32, #tpu.memory_space<vmem>>, %arg5: memref<1x1xf32, #tpu.memory_space<vmem>>, %arg6: memref<32x1xf32, #tpu.memory_space<vmem>>) attributes {dimension_semantics = [#tpu.dimension_semantics<parallel>], iteration_bounds = array<i64: 2>, scalar_prefetch = 0 : i64, scratch_operands = 0 : i64, tpu.core_type = #tpu.core_type<tc>, window_params = [{transform_indices = @transform_0, window_bounds = array<i64: 32, 32>}, {pipeline_mode = #tpu.pipeline_mode<synchronous>, transform_indices = @transform_1, window_bounds = array<i64: 32, 256>}, {pipeline_mode = #tpu.pipeline_mode<synchronous>, transform_indices = @transform_2, window_bounds = array<i64: 1, 256>}, {pipeline_mode = #tpu.pipeline_mode<synchronous>, transform_indices = @transform_3, window_bounds = array<i64: 1, 128>}, {pipeline_mode = #tpu.pipeline_mode<synchronous>, transform_indices = @transform_4, window_bounds = array<i64: 1, 1>}, {transform_indices = @transform_5, window_bounds = array<i64: 32, 1>}]} {
    %c0 = arith.constant 0 : index
    %c0_0 = arith.constant 0 : index
    %0 = vector.load %arg1[%c0, %c0_0] : memref<32x32xf32, #tpu.memory_space<vmem>>, vector<32x32xf32>
    %c0_1 = arith.constant 0 : index
    %c0_2 = arith.constant 0 : index
    %1 = vector.load %arg2[%c0_1, %c0_2] : memref<32x256xf32, #tpu.memory_space<vmem>>, vector<32x256xf32>
    %cst = arith.constant dense<0.000000e+00> : vector<32x256xf32>
    %2 = tpu.matmul %0, %1, %cst {dimension_numbers = #tpu.dot_dimension_numbers<[1], [0], [0], [1], [0, 0, 1, 1], [], []>} : vector<32x32xf32>, vector<32x256xf32>, vector<32x256xf32> -> vector<32x256xf32>
    %c0_3 = arith.constant 0 : index
    %c0_4 = arith.constant 0 : index
    %3 = vector.load %arg3[%c0_3, %c0_4] : memref<1x256xf32, #tpu.memory_space<vmem>>, vector<1x256xf32>
    %4 = vector.broadcast %3 : vector<1x256xf32> to vector<32x256xf32>
    %5 = arith.addf %2, %4 : vector<32x256xf32>
    %6 = vector.extract_strided_slice %5 {offsets = [0, 0], sizes = [32, 128], strides = [1, 1]} : vector<32x256xf32> to vector<32x128xf32>
    %7 = math.tanh %6 : vector<32x128xf32>
    %8 = vector.extract_strided_slice %5 {offsets = [0, 128], sizes = [32, 128], strides = [1, 1]} : vector<32x256xf32> to vector<32x128xf32>
    %cst_5 = arith.constant 5.000000e-01 : f32
    %9 = vector.broadcast %cst_5 : f32 to vector<32x128xf32>
    %10 = arith.mulf %9, %8 : vector<32x128xf32>
    %11 = math.tanh %10 : vector<32x128xf32>
    %cst_6 = arith.constant 1.000000e+00 : f32
    %12 = vector.broadcast %cst_6 : f32 to vector<32x128xf32>
    %13 = arith.addf %11, %12 : vector<32x128xf32>
    %cst_7 = arith.constant 5.000000e-01 : f32
    %14 = vector.broadcast %cst_7 : f32 to vector<32x128xf32>
    %15 = arith.mulf %14, %13 : vector<32x128xf32>
    %16 = arith.mulf %7, %15 : vector<32x128xf32>
    %c0_8 = arith.constant 0 : index
    %c0_9 = arith.constant 0 : index
    %17 = vector.load %arg4[%c0_8, %c0_9] : memref<1x128xf32, #tpu.memory_space<vmem>>, vector<1x128xf32>
    %18 = vector.broadcast %17 : vector<1x128xf32> to vector<32x128xf32>
    %19 = arith.mulf %16, %18 : vector<32x128xf32>
    %cst_10 = arith.constant dense<0.000000e+00> : vector<32xf32>
    %20 = vector.multi_reduction <add>, %19, %cst_10 [1] : vector<32x128xf32> to vector<32xf32>
    %21 = vector.shape_cast %20 : vector<32xf32> to vector<32x1xf32>
    %c0_11 = arith.constant 0 : index
    %c0_12 = arith.constant 0 : index
    %22 = vector.load %arg5[%c0_11, %c0_12] : memref<1x1xf32, #tpu.memory_space<vmem>>, vector<1x1xf32>
    %23 = vector.broadcast %22 : vector<1x1xf32> to vector<32x1xf32>
    %24 = arith.addf %21, %23 : vector<32x1xf32>
    %c0_13 = arith.constant 0 : index
    %c0_14 = arith.constant 0 : index
    %25 = vector.load %arg6[%c0_13, %c0_14] : memref<32x1xf32, #tpu.memory_space<vmem>>, vector<32x1xf32>
    tpu.vector_store %arg6[%c0_13, %c0_14], %24 {strides = array<i32>} : memref<32x1xf32, #tpu.memory_space<vmem>>, vector<32x1xf32>,
    return
  }
  func.func @transform_0(%arg0: i32) -> (i32, i32) {
    %c0_i32 = arith.constant 0 : i32
    %c0_i32_0 = arith.constant 0 : i32
    return %arg0, %c0_i32 : i32, i32
  }
  func.func @transform_1(%arg0: i32) -> (i32, i32) {
    %c0_i32 = arith.constant 0 : i32
    %c0_i32_0 = arith.constant 0 : i32
    %c0_i32_1 = arith.constant 0 : i32
    return %c0_i32, %c0_i32_0 : i32, i32
  }
  func.func @transform_2(%arg0: i32) -> (i32, i32) {
    %c0_i32 = arith.constant 0 : i32
    %c0_i32_0 = arith.constant 0 : i32
    %c0_i32_1 = arith.constant 0 : i32
    return %c0_i32, %c0_i32_0 : i32, i32
  }
  func.func @transform_3(%arg0: i32) -> (i32, i32) {
    %c0_i32 = arith.constant 0 : i32
    %c0_i32_0 = arith.constant 0 : i32
    %c0_i32_1 = arith.constant 0 : i32
    return %c0_i32, %c0_i32_0 : i32, i32
  }
  func.func @transform_4(%arg0: i32) -> (i32, i32) {
    %c0_i32 = arith.constant 0 : i32
    %c0_i32_0 = arith.constant 0 : i32
    %c0_i32_1 = arith.constant 0 : i32
    return %c0_i32, %c0_i32_0 : i32, i32
  }
  func.func @transform_5(%arg0: i32) -> (i32, i32) {
    %c0_i32 = arith.constant 0 : i32
    %c0_i32_0 = arith.constant 0 : i32
    return %arg0, %c0_i32 : i32, i32
  }
}

</mosaic_0001>

<bundles_post_ra>
// kernel: tpu_custom_call.1
= control target key start
LH: loop header
LB: loop body
LE: loop exit
PB: predicated region body
PF: predicated region fallthrough
CT: control target
= control target key end

     0   :  { %s563_s20 = smov 0   ;;  %s617_s0 = inlined_call_operand.vmem [shape: f32[64,32], index: 0, kind: input, shape index: {}]   ;;  %s618_s1 = inlined_call_operand.vmem [shape: f32[32,256], index: 1, kind: input, shape index: {}]   ;;  %s619_s2 = inlined_call_operand.vmem [shape: f32[1,256], index: 2, kind: input, shape index: {}]   ;;  %s620_s3 = inlined_call_operand.vmem [shape: f32[1,128], index: 3, kind: input, shape index: {}]   ;;  %s621_s4 = inlined_call_operand.<no memory space> [shape: f32[1,1], index: 4, kind: input, shape index: {}]   ;;  %s622_s5 = inlined_call_operand.vmem [shape: f32[64,1], index: 5, kind: output, shape index: {}]  }
   0x1   :  { %v10_v0 = vstv %s621_s4 }
   0x2   :  { %11 = vst [vmem:[#allocation2] sm:$0x1] %v10_v0 }
   0x3 LB: > { %s471_s21 = sadd.s32 4294967295, %s527_s20   ;;  %p475_p0 = scmp.ge.s32.totalorder %s527_s20, 1  ;;  %s527_s20 = sphi %s563_s20, %s17_s20  }
   0x4   : > { %p190_p1 = scmp.lt.s32.totalorder %s527_s20, 3 }
   0x6   : > { %p191_p2 = pnand %p475_p0, %p190_p1 }
   0x7   : > { %s476_s27 = sshll.u32 (!%p191_p2), %s471_s21, 2 }
   0x8   : > { %194 = sbr.rel (%p191_p2) target bundleno = 390 (0x186), region = 40  ;;  %p219_p3 = scmp.lt.s32.totalorder (!%p191_p2), %s476_s27, 7 }
   0xd   : > { %v241_v1 = vld [vmem:[%s618_s1 + $0x38] sm:$0xff]  ;;  %v240_v2 = vld [vmem:[%s618_s1 + $0x30] sm:$0xff]  ;;  %v239_v3 = vld [vmem:[%s618_s1 + $0x28] sm:$0xff]  ;;  %s624_s27 = smov (!%p219_p3, %s476_s27), 7  ;;  %vm254_vm0 = vcmask 261120   ;;  %v529_v11 = vmov 0.0   ;;  %v244_v14 = vlaneseq }
   0xe   : > { %291 = vmatprep.subr.mxu0 %v241_v1  ;;  %488 = vmatprep.subr.mxu1 %v241_v1  ;;  %v238_v4 = vld [vmem:[%s618_s1 + $0x20] sm:$0xff]  ;;  %v237_v5 = vld [vmem:[%s618_s1 + $0x18] sm:$0xff]  ;;  %v236_v6 = vld [vmem:[%s618_s1 + $0x10] sm:$0xff]  ;;  %s477_s13 = sshll.u32 %s624_s27, 3  ;;  %vm410_vm1 = vcmask 7168  }
   0xf   : > { %292 = vmatpush1.msra.mxu0 %v240_v2  ;;  %492 = vmatpush1.msra.mxu1 %v240_v2  ;;  %v235_v7 = vld [vmem:[%s618_s1 + $0x8] sm:$0xff]  ;;  %v234_v8 = vld [vmem:[%s618_s1] sm:$0xff]  ;;  %s222_s16 = scalar_lea.vmem %s617_s0, %s477_s13  ;;  %v245_v15 = vshrl.u32 %v244_v14, 7  ;;  %s228_s4 = scalar_lea.vmem %s622_s5, %s477_s13 }
  0x10   : > { %293 = vmatprep.subr.mxu0 %v239_v3  ;;  %489 = vmatprep.subr.mxu1 %v239_v3  ;;  %v230_v9 = vld [vmem:[%s222_s16] sm:$0xff]  ;;  %v232_v10 = vld [vmem:[%s222_s16 + $0x10] sm:$0xff]  ;;  %v231_v12 = vld [vmem:[%s222_s16 + $0x8] sm:$0xff] }
  0x11   : > { %294 = vmatpush1.msra.mxu0 %v238_v4  ;;  %493 = vmatpush1.msra.mxu1 %v238_v4  ;;  %v233_v13 = vld [vmem:[%s222_s16 + $0x18] sm:$0xff]  ;;  %v250_v16 = vsub.s32 1, %v245_v15  ;;  %v246_v17 = vsub.s32 0, %v245_v15  ;;  %v242_v18 = vld [vmem:[%s619_s2] sm:$0x3] }
  0x12   : > { %295 = vmatprep.subr.mxu0 %v237_v5  ;;  %490 = vmatprep.subr.mxu1 %v237_v5  ;;  %v484_v50 = vld [vmem:[%s620_s3] ss:$0 sm:$0xff] }
  0x13   : > { %296 = vmatpush1.msra.mxu0 %v236_v6  ;;  %494 = vmatpush1.msra.mxu1 %v236_v6  ;;  %v251_v19 = vrot.slane %v242_v18, %v250_v16  ;;  %v247_v22 = vrot.slane %v242_v18, %v246_v17  ;;  %v485_v2 = vld [vmem:[#allocation2] ss:$0 sm:$0xff] }
  0x14   : > { %297 = vmatprep.subr.mxu0 %v235_v7  ;;  %491 = vmatprep.subr.mxu1 %v235_v7 }
  0x15   : > { %298 = vmatpush1.msra.mxu0 %v234_v8  ;;  %495 = vmatpush1.msra.mxu1 %v234_v8 }
  0x16   : > { %331 = vmatprep.mubr.f32.mxu0 %v529_v11  ;;  %343 = vmatprep.mubr.f32.mxu1 %v529_v11 }
  0x17   : > { %480 = vmatmul.mubr.msk.f32.vlgmr.msra.gmra.mxu0 %vm254_vm0, %v230_v9  ;;  %482 = vmatmul.mubr.msk.f32.vlgmr.msra.gmra.mxu1 %vm254_vm0, %v232_v10 }
  0x18   : > { %337 = vmatprep.mubr.f32.mxu0 %v529_v11  ;;  %349 = vmatprep.mubr.f32.mxu1 %v529_v11 }
  0x1b   : > { %481 = vmatmul.mubr.msk.f32.gmra.mxu0 %vm254_vm0, %v231_v12  ;;  %483 = vmatmul.mubr.msk.f32.gmra.mxu1 %vm254_vm0, %v233_v13 }
  0xd7   : > { %v333_v20 = vpop.f32.mrf.mxu0  ;;  %v345_v21 = vpop.f32.mrf.mxu1 }
  0xd8   : > { %v334_v29 = vadd.f32 %v333_v20, %v247_v22  ;;  %v346_v32 = vadd.f32 %v345_v21, %v247_v22 }
  0xd9   : > { %v335_v23 = vpop.f32.mrf.mxu0  ;;  %v347_v24 = vpop.f32.mrf.mxu1 }
  0xda   : > { %v336_v25 = vadd.f32 %v335_v23, %v251_v19  ;;  %v348_v26 = vadd.f32 %v347_v24, %v251_v19 }
  0xdb   : > { %v339_v27 = vpop.f32.mrf.mxu0  ;;  %v351_v28 = vpop.f32.mrf.mxu1 }
  0xdc   : > { %v360_v30 = vmul.f32 0.5, %v336_v25  ;;  %v362_v31 = vmul.f32 0.5, %v348_v26  ;;  %v340_v39 = vadd.f32 %v339_v27, %v247_v22  ;;  %v352_v40 = vadd.f32 %v351_v28, %v247_v22 }
  0xdd   : > { %v341_v33 = vpop.f32.mrf.mxu0  ;;  %v353_v34 = vpop.f32.mrf.mxu1 }
  0xde   : > { %505 = vtanh.f32 %v360_v30  ;;  %v342_v35 = vadd.f32 %v341_v33, %v251_v19  ;;  %v354_v36 = vadd.f32 %v353_v34, %v251_v19 }
  0xdf   : > { %507 = vtanh.f32 %v362_v31 }
  0xe0   : > { %509 = vtanh.f32 %v334_v29  ;;  %v361_v37 = vmul.f32 0.5, %v342_v35  ;;  %v363_v38 = vmul.f32 0.5, %v354_v36 }
  0xe1   : > { %511 = vtanh.f32 %v346_v32 }
  0xe2   : > { %513 = vtanh.f32 %v361_v37 }
  0xe3   : > { %515 = vtanh.f32 %v363_v38 }
  0xe4   : > { %517 = vtanh.f32 %v340_v39 }
  0xe5   : > { %519 = vtanh.f32 %v352_v40 }
  0xeb   : > { %v506_v41 = vpop.eup %505 }
  0xec   : > { %v508_v42 = vpop.eup %507  ;;  %v368_v43 = vadd.f32 1.0, %v506_v41 }
  0xed   : > { %v510_v44 = vpop.eup %509  ;;  %v370_v45 = vadd.f32 1.0, %v508_v42 }
  0xee   : > { %v512_v46 = vpop.eup %511  ;;  %v372_v47 = vmul.f32 0.5, %v368_v43 }
  0xef   : > { %v514_v48 = vpop.eup %513  ;;  %v374_v49 = vmul.f32 0.5, %v370_v45 }
  0xf0   : > { %v516_v51 = vpop.eup %515  ;;  %v369_v52 = vadd.f32 1.0, %v514_v48  ;;  %v376_v53 = vmul.f32 %v510_v44, %v372_v47 }
  0xf1   : > { %v371_v54 = vadd.f32 1.0, %v516_v51  ;;  %v378_v55 = vmul.f32 %v512_v46, %v374_v49  ;;  %v518_v58 = vpop.eup %517 }
  0xf2   : > { %v387_v56 = vmul.f32 %v484_v50, %v376_v53  ;;  %v373_v57 = vmul.f32 0.5, %v369_v52  ;;  %v520_v61 = vpop.eup %519 }
  0xf3   : > { %v389_v59 = vmul.f32 %v484_v50, %v378_v55  ;;  %v375_v60 = vmul.f32 0.5, %v371_v54 }
  0xf4   : > { %391 = vadd.xlane.f32.xlu0 %v387_v56  ;;  %v377_v62 = vmul.f32 %v518_v58, %v373_v57 }
  0xf5   : > { %395 = vadd.xlane.f32.xlu1 %v389_v59  ;;  %v379_v63 = vmul.f32 %v520_v61, %v375_v60 }
  0xf6   : > { %v388_v0 = vmul.f32 %v484_v50, %v377_v62 }
  0xf7   : > { %v390_v1 = vmul.f32 %v484_v50, %v379_v63 }
  0xf8   : > { %393 = vadd.xlane.f32.xlu0 %v388_v0 }
  0xf9   : > { %397 = vadd.xlane.f32.xlu1 %v390_v1 }
 0x17d   : > { %v392_v3 = vpop.xlane.xlu0 %391 }
 0x17e   : > { %v396_v4 = vpop.xlane.xlu1 %395  ;;  %v406_v5 = vadd.f32 %v485_v2, %v392_v3 }
 0x17f   : > { %v408_v9 = vadd.f32 %v485_v2, %v396_v4 }
 0x180   : > { %411 = vst.msk [vmem:[%s228_s4] sm:$0xff] %vm410_vm1, %v406_v5 }
 0x181   : > { %v394_v6 = vpop.xlane.xlu0 %393  ;;  %413 = vst.msk [vmem:[%s228_s4 + $0x10] sm:$0xff] %vm410_vm1, %v408_v9 }
 0x182   : > { %v398_v7 = vpop.xlane.xlu1 %397  ;;  %v407_v8 = vadd.f32 %v485_v2, %v394_v6 }
 0x183   : > { %v409_v10 = vadd.f32 %v485_v2, %v398_v7 }
 0x184   : > { %412 = vst.msk [vmem:[%s228_s4 + $0x8] sm:$0xff] %vm410_vm1, %v407_v8 }
 0x185   : > { %414 = vst.msk [vmem:[%s228_s4 + $0x18] sm:$0xff] %vm410_vm1, %v409_v10 }
 0x186 PF: > { %s17_s20 = sadd.s32 1, %s527_s20  }
 0x187   : > { %p14_p4 = scmp.ge.s32.totalorder %s17_s20, 4  }
 0x189   :  { %16 = sbr.rel (!%p14_p4) target bundleno = 3 (0x3), region = 70 }

</bundles_post_ra>
